<compile_context>
chip_gen: v6e
topology: v6e:2x2x1
jax: 0.10.0
libtpu: 0.0.40
codegen_flags: <defaults>
</compile_context>

<pallas_src>
import functools
import math

import jax
import jax.numpy as jnp
from jax.experimental import pallas as pl
from jax.experimental.pallas import tpu as pltpu


def _round_up(n, m):
    return ((n + m - 1) // m) * m


def _choose_tiles(batch, tile_b):
    """Pick (n_tiles, tb, b_pad): minimal padding, >=2 steps for megacore."""
    b8 = _round_up(batch, 8)
    n_tiles = max(1, pl.cdiv(b8, tile_b))
    if n_tiles == 1 and b8 >= 16:
        n_tiles = 2            # let v7x's second TensorCore have a grid step
    tb = _round_up(pl.cdiv(b8, n_tiles), 8)
    b_pad = n_tiles * tb
    return n_tiles, tb, b_pad


def critic_mlp_kernel(xa_ref, w1_ref, b1_ref, w2_ref, b2_ref, w3_ref, b3_ref,
                      o_ref):
    """Fused 3-layer MLP for one batch tile.

    h1 = relu(xa @ W1 + b1)      (one 16-row bf16 MXU matmul, f32 acc)
    h2 = relu(h1 @ W2 + b2)      (bf16 MXU matmul, f32 acc)
    q  = w3_row @ h2^T + b3      (tiny MXU matmul -> lane-dense [1, TB] row)
    """
    w_dtype = w1_ref.dtype                                     # bf16

    xa = xa_ref[...]                                           # [TB, 16] bf16

    # Layer 1: bias-add in f32, ReLU + downcast in bf16.
    h1 = jnp.dot(xa, w1_ref[...],
                 preferred_element_type=jnp.float32) + b1_ref[...]
    h1 = jnp.maximum(h1.astype(w_dtype), 0)                    # [TB, H1] bf16

    # Layer 2.
    h2 = jnp.dot(h1, w2_ref[...],
                 preferred_element_type=jnp.float32) + b2_ref[...]
    h2 = jnp.maximum(h2.astype(w_dtype), 0)                    # [TB, H2] bf16

    # Head (H2 -> 1): contract over H2 with the batch landing in the lane dim,
    # so the store is an unmasked lane-dense row rather than a (TB, 1) masked
    # column store.
    q = jax.lax.dot_general(
        w3_ref[...], h2,
        dimension_numbers=(((1,), (1,)), ((), ())),
        preferred_element_type=jnp.float32)                    # [1, TB] f32
    o_ref[0] = (q + b3_ref[...]).astype(o_ref.dtype)


@functools.partial(jax.jit, static_argnames=("tile_b",))
def critic_forward(x, action, params, tile_b=1024):
    """Batch-tiled fused Pallas critic forward.  Returns (B, 1) f32."""
    w1, b1, w2, b2, w3, b3 = params
    B = x.shape[0]
    sa = x.shape[1] + action.shape[1]
    in_pad, H1 = w1.shape
    H2 = w2.shape[1]

    n_tiles, tb, b_pad = _choose_tiles(B, tile_b)

    # Pre-pack [x || action] into one lane-padded bf16 slab: one DMA per tile
    # (32 B/row vs. 40 B/row for separate f32 inputs) and the f32->bf16 casts
    # move out of the kernel.
    xa = jnp.concatenate([x, action], axis=1).astype(w1.dtype)  # (B, S+A)
    xa = jnp.pad(xa, ((0, b_pad - B), (0, in_pad - sa)))        # (b_pad, 16)

    batch_tile = lambda i: (i, 0)   # activations march over the batch
    resident = lambda i: (0, 0)     # weights stay put in VMEM across steps

    out = pl.pallas_call(
        critic_mlp_kernel,
        out_shape=jax.ShapeDtypeStruct((n_tiles, 1, tb), jnp.float32),
        grid=(n_tiles,),
        in_specs=[
            pl.BlockSpec((tb, in_pad), batch_tile),     # packed [x || action]
            pl.BlockSpec((in_pad, H1), resident),       # W1 (merged, padded)
            pl.BlockSpec((1, H1), resident),            # b1
            pl.BlockSpec((H1, H2), resident),           # W2
            pl.BlockSpec((1, H2), resident),            # b2
            pl.BlockSpec((1, H2), resident),            # W3 (row)
            pl.BlockSpec((1, 1), resident),             # b3
        ],
        out_specs=pl.BlockSpec((1, 1, tb), lambda i: (i, 0, 0)),
        compiler_params=pltpu.CompilerParams(
            dimension_semantics=("parallel",)),
    )(xa, w1, b1, w2, b2, w3, b3)

    # (n_tiles, 1, tb) lane-dense slab -> (B, 1); padded rows are sliced off.
    return out.reshape(b_pad)[:B].reshape(B, 1)


def init_critic_params(key, state_dim=8, action_dim=2, hidden_dim=(512, 256),
                       weight_dtype=jnp.bfloat16):
    """Init mimicking nn.Linear default (U[-1/sqrt(fan_in), +1/sqrt(fan_in)]).

    Weights are stored transposed ([in, out]) vs PyTorch; layer-1's weight is
    the merged [x || action] matrix zero-padded to a multiple of 16 input rows;
    W3 is stored as a row [1, H2].  Matmul weights are cast to bf16, biases f32.
    """
    S, A, (H1, H2) = state_dim, action_dim, hidden_dim
    in_dim = S + A
    in_pad = _round_up(in_dim, 16)

    k1w, k1b, k2w, k2b, k3w, k3b = jax.random.split(key, 6)

    bound1 = 1.0 / math.sqrt(in_dim)
    w1 = jax.random.uniform(k1w, (in_dim, H1), jnp.float32, -bound1, bound1)
    w1 = jnp.pad(w1, ((0, in_pad - in_dim), (0, 0)))   # zero rows: pad cols no-op
    b1 = jax.random.uniform(k1b, (1, H1), jnp.float32, -bound1, bound1)

    bound2 = 1.0 / math.sqrt(H1)
    w2 = jax.random.uniform(k2w, (H1, H2), jnp.float32, -bound2, bound2)
    b2 = jax.random.uniform(k2b, (1, H2), jnp.float32, -bound2, bound2)

    bound3 = 1.0 / math.sqrt(H2)
    w3 = jax.random.uniform(k3w, (1, H2), jnp.float32, -bound3, bound3)
    b3 = jax.random.uniform(k3b, (1, 1), jnp.float32, -bound3, bound3)

    return (w1.astype(weight_dtype), b1,
            w2.astype(weight_dtype), b2,
            w3.astype(weight_dtype), b3)


def critic_forward_ref(x, action, params):
    """Pure-JAX reference with the same bf16-operand / f32-accumulate numerics."""
    w1, b1, w2, b2, w3, b3 = params
    wd = w1.dtype
    sa = x.shape[1] + action.shape[1]
    in_pad = w1.shape[0]

    xa = jnp.concatenate([x, action], axis=1).astype(wd)
    xa = jnp.pad(xa, ((0, 0), (0, in_pad - sa)))
    h1 = jnp.dot(xa, w1, preferred_element_type=jnp.float32) + b1
    h1 = jnp.maximum(h1.astype(wd), 0)
    h2 = jnp.dot(h1, w2, preferred_element_type=jnp.float32) + b2
    h2 = jnp.maximum(h2.astype(wd), 0)
    q = jax.lax.dot_general(w3, h2,
                            dimension_numbers=(((1,), (1,)), ((), ())),
                            preferred_element_type=jnp.float32) + b3
    return q.T                                                  # (B, 1)


if __name__ == "__main__":
    key = jax.random.PRNGKey(0)
    k_params, k_x, k_a = jax.random.split(key, 3)

    batch, state_dim, action_dim = 4, 8, 2
    params = init_critic_params(k_params, state_dim, action_dim, (512, 256))
    x = jax.random.normal(k_x, (batch, state_dim), jnp.float32)
    action = jax.random.normal(k_a, (batch, action_dim), jnp.float32)

    q = critic_forward(x, action, params)
    q = jax.block_until_ready(q)

    q_ref = critic_forward_ref(x, action, params)
    assert q.shape == (batch, 1), q.shape
    max_err = float(jnp.max(jnp.abs(q - q_ref)))
    assert jnp.allclose(q, q_ref, atol=2e-3, rtol=2e-3), (
        f"Pallas kernel mismatch vs JAX reference (max abs err {max_err})")

    print("KERNEL_OK")
</pallas_src>

<mosaic_0001>
module attributes {stable_mosaic.version = 11 : i64} {
  func.func @critic_mlp_kernel(%arg0: i32, %arg1: memref<8x16xbf16, #tpu.memory_space<vmem>>, %arg2: memref<16x512xbf16, #tpu.memory_space<vmem>>, %arg3: memref<1x512xf32, #tpu.memory_space<vmem>>, %arg4: memref<512x256xbf16, #tpu.memory_space<vmem>>, %arg5: memref<1x256xf32, #tpu.memory_space<vmem>>, %arg6: memref<1x256xbf16, #tpu.memory_space<vmem>>, %arg7: memref<1x1xf32, #tpu.memory_space<vmem>>, %arg8: memref<1x1x8xf32, #tpu.memory_space<vmem>>) attributes {dimension_semantics = [#tpu.dimension_semantics<parallel>], iteration_bounds = array<i64: 1>, scalar_prefetch = 0 : i64, scratch_operands = 0 : i64, tpu.core_type = #tpu.core_type<tc>, window_params = [{transform_indices = @transform_0, window_bounds = array<i64: 8, 16>}, {pipeline_mode = #tpu.pipeline_mode<synchronous>, transform_indices = @transform_1, window_bounds = array<i64: 16, 512>}, {pipeline_mode = #tpu.pipeline_mode<synchronous>, transform_indices = @transform_2, window_bounds = array<i64: 1, 512>}, {pipeline_mode = #tpu.pipeline_mode<synchronous>, transform_indices = @transform_3, window_bounds = array<i64: 512, 256>}, {pipeline_mode = #tpu.pipeline_mode<synchronous>, transform_indices = @transform_4, window_bounds = array<i64: 1, 256>}, {pipeline_mode = #tpu.pipeline_mode<synchronous>, transform_indices = @transform_5, window_bounds = array<i64: 1, 256>}, {pipeline_mode = #tpu.pipeline_mode<synchronous>, transform_indices = @transform_6, window_bounds = array<i64: 1, 1>}, {transform_indices = @transform_7, window_bounds = array<i64: 1, 1, 8>}]} {
    %c0 = arith.constant 0 : index
    %c0_0 = arith.constant 0 : index
    %0 = vector.load %arg1[%c0, %c0_0] : memref<8x16xbf16, #tpu.memory_space<vmem>>, vector<8x16xbf16>
    %c0_1 = arith.constant 0 : index
    %c0_2 = arith.constant 0 : index
    %1 = vector.load %arg2[%c0_1, %c0_2] : memref<16x512xbf16, #tpu.memory_space<vmem>>, vector<16x512xbf16>
    %cst = arith.constant dense<0.000000e+00> : vector<8x512xf32>
    %2 = tpu.matmul %0, %1, %cst {dimension_numbers = #tpu.dot_dimension_numbers<[1], [0], [0], [1], [0, 0, 1, 1], [], []>} : vector<8x16xbf16>, vector<16x512xbf16>, vector<8x512xf32> -> vector<8x512xf32>
    %c0_3 = arith.constant 0 : index
    %c0_4 = arith.constant 0 : index
    %3 = vector.load %arg3[%c0_3, %c0_4] : memref<1x512xf32, #tpu.memory_space<vmem>>, vector<1x512xf32>
    %4 = vector.broadcast %3 : vector<1x512xf32> to vector<8x512xf32>
    %5 = arith.addf %2, %4 : vector<8x512xf32>
    %6 = arith.truncf %5 : vector<8x512xf32> to vector<8x512xbf16>
    %cst_5 = arith.constant 0.000000e+00 : bf16
    %7 = vector.broadcast %cst_5 : bf16 to vector<8x512xbf16>
    %8 = arith.maximumf %6, %7 : vector<8x512xbf16>
    %c0_6 = arith.constant 0 : index
    %c0_7 = arith.constant 0 : index
    %9 = vector.load %arg4[%c0_6, %c0_7] : memref<512x256xbf16, #tpu.memory_space<vmem>>, vector<512x256xbf16>
    %cst_8 = arith.constant dense<0.000000e+00> : vector<8x256xf32>
    %10 = tpu.matmul %8, %9, %cst_8 {dimension_numbers = #tpu.dot_dimension_numbers<[1], [0], [0], [1], [0, 0, 1, 1], [], []>} : vector<8x512xbf16>, vector<512x256xbf16>, vector<8x256xf32> -> vector<8x256xf32>
    %c0_9 = arith.constant 0 : index
    %c0_10 = arith.constant 0 : index
    %11 = vector.load %arg5[%c0_9, %c0_10] : memref<1x256xf32, #tpu.memory_space<vmem>>, vector<1x256xf32>
    %12 = vector.broadcast %11 : vector<1x256xf32> to vector<8x256xf32>
    %13 = arith.addf %10, %12 : vector<8x256xf32>
    %14 = arith.truncf %13 : vector<8x256xf32> to vector<8x256xbf16>
    %cst_11 = arith.constant 0.000000e+00 : bf16
    %15 = vector.broadcast %cst_11 : bf16 to vector<8x256xbf16>
    %16 = arith.maximumf %14, %15 : vector<8x256xbf16>
    %c0_12 = arith.constant 0 : index
    %c0_13 = arith.constant 0 : index
    %17 = vector.load %arg6[%c0_12, %c0_13] : memref<1x256xbf16, #tpu.memory_space<vmem>>, vector<1x256xbf16>
    %cst_14 = arith.constant dense<0.000000e+00> : vector<1x8xf32>
    %18 = tpu.matmul %17, %16, %cst_14 {dimension_numbers = #tpu.dot_dimension_numbers<[1], [1], [0], [0], [0, 0, 1, 0], [], []>} : vector<1x256xbf16>, vector<8x256xbf16>, vector<1x8xf32> -> vector<1x8xf32>
    %c0_15 = arith.constant 0 : index
    %c0_16 = arith.constant 0 : index
    %19 = vector.load %arg7[%c0_15, %c0_16] : memref<1x1xf32, #tpu.memory_space<vmem>>, vector<1x1xf32>
    %20 = vector.broadcast %19 : vector<1x1xf32> to vector<1x8xf32>
    %21 = arith.addf %18, %20 : vector<1x8xf32>
    %c0_17 = arith.constant 0 : index
    %c0_18 = arith.constant 0 : index
    %c0_19 = arith.constant 0 : index
    %22 = vector.load %arg8[%c0_17, %c0_18, %c0_19] : memref<1x1x8xf32, #tpu.memory_space<vmem>>, vector<1x1x8xf32>
    %23 = vector.shape_cast %22 : vector<1x1x8xf32> to vector<1x8xf32>
    %24 = vector.shape_cast %21 : vector<1x8xf32> to vector<1x1x8xf32>
    tpu.vector_store %arg8[%c0_17, %c0_18, %c0_19], %24 {strides = array<i32>} : memref<1x1x8xf32, #tpu.memory_space<vmem>>, vector<1x1x8xf32>,
    return
  }
  func.func @transform_0(%arg0: i32) -> (i32, i32) {
    %c0_i32 = arith.constant 0 : i32
    %c0_i32_0 = arith.constant 0 : i32
    return %arg0, %c0_i32 : i32, i32
  }
  func.func @transform_1(%arg0: i32) -> (i32, i32) {
    %c0_i32 = arith.constant 0 : i32
    %c0_i32_0 = arith.constant 0 : i32
    %c0_i32_1 = arith.constant 0 : i32
    return %c0_i32, %c0_i32_0 : i32, i32
  }
  func.func @transform_2(%arg0: i32) -> (i32, i32) {
    %c0_i32 = arith.constant 0 : i32
    %c0_i32_0 = arith.constant 0 : i32
    %c0_i32_1 = arith.constant 0 : i32
    return %c0_i32, %c0_i32_0 : i32, i32
  }
  func.func @transform_3(%arg0: i32) -> (i32, i32) {
    %c0_i32 = arith.constant 0 : i32
    %c0_i32_0 = arith.constant 0 : i32
    %c0_i32_1 = arith.constant 0 : i32
    return %c0_i32, %c0_i32_0 : i32, i32
  }
  func.func @transform_4(%arg0: i32) -> (i32, i32) {
    %c0_i32 = arith.constant 0 : i32
    %c0_i32_0 = arith.constant 0 : i32
    %c0_i32_1 = arith.constant 0 : i32
    return %c0_i32, %c0_i32_0 : i32, i32
  }
  func.func @transform_5(%arg0: i32) -> (i32, i32) {
    %c0_i32 = arith.constant 0 : i32
    %c0_i32_0 = arith.constant 0 : i32
    %c0_i32_1 = arith.constant 0 : i32
    return %c0_i32, %c0_i32_0 : i32, i32
  }
  func.func @transform_6(%arg0: i32) -> (i32, i32) {
    %c0_i32 = arith.constant 0 : i32
    %c0_i32_0 = arith.constant 0 : i32
    %c0_i32_1 = arith.constant 0 : i32
    return %c0_i32, %c0_i32_0 : i32, i32
  }
  func.func @transform_7(%arg0: i32) -> (i32, i32, i32) {
    %c0_i32 = arith.constant 0 : i32
    %c0_i32_0 = arith.constant 0 : i32
    %c0_i32_1 = arith.constant 0 : i32
    return %arg0, %c0_i32, %c0_i32_0 : i32, i32, i32
  }
}

</mosaic_0001>

<bundles_post_ra>
// kernel: critic_forward.1
= control target key start
LH: loop header
LB: loop body
LE: loop exit
PB: predicated region body
PF: predicated region fallthrough
CT: control target
= control target key end

     0   :  { %s1076_s0 = inlined_call_operand.vmem [shape: bf16[8,16], index: 0, kind: input, shape index: {}]   ;;  %s1077_s1 = inlined_call_operand.hbm [shape: bf16[16,512], index: 1, kind: input, shape index: {}]   ;;  %s1078_s2 = inlined_call_operand.vmem [shape: f32[1,512], index: 2, kind: input, shape index: {}]   ;;  %s1079_s3 = inlined_call_operand.hbm [shape: bf16[512,256], index: 3, kind: input, shape index: {}]   ;;  %s1080_s4 = inlined_call_operand.vmem [shape: f32[1,256], index: 4, kind: input, shape index: {}]   ;;  %s1081_s5 = inlined_call_operand.vmem [shape: bf16[1,256], index: 5, kind: input, shape index: {}]   ;;  %s1082_s6 = inlined_call_operand.<no memory space> [shape: f32[1,1], index: 6, kind: input, shape index: {}]   ;;  %s1083_s7 = inlined_call_operand.vmem [shape: f32[1,1,8], index: 7, kind: output, shape index: {}]  }
   0x1   :  { %v12_v0 = vstv %s1082_s6 }
   0x2   :  { %13 = vst [vmem:[#allocation2] sm:$0x1] %v12_v0 }
   0x3   :  { %14 = vsyncpa [#allocation4], 0 }
   0x4   :  { %15 = vsyncpa [#allocation6], 0  ;;  %s990_s26 = smov [#allocation3]  }
   0x5   :  { %s23_s27 = sshll.u32 %s990_s26, 4  ;;  %s24_s27 = int_to_ptr.vmem [resolvable:$true] %s23_s27 }
   0x6   :  { %s954_s28 = scalar_lea.vmem %s24_s27, 512  ;;  %p959_p1 = scmp.lt.s32.totalorder %s24_s27, %s24_s27 }
   0x7   :  { %p955_p0 = scmp.ne.s32.totalorder %s24_s27, %s954_s28  ;;  %p960_p2 = scmp.lt.s32.totalorder %s954_s28, %s954_s28 }
   0x9   :  { %p961_p3 = por %p960_p2, %p959_p1 }
   0xb   :  { %p962_p4 = pnand %p961_p3, %p955_p0 }
   0xd   :  { %965 = shalt.err (!%p962_p4)
}
   0xe   :  { %s991_s29 = smov 256   ;;  %s992_s30 = smov 16  }
   0xf   :  { %29 = dma.hbm_to_vmem [thread:$0]  %s1077_s1, 512, %s24_s27, [#allocation4], %s991_s29, %s991_s29, %s992_s30  }
  0x10   :  { %s993_s6 = smov [#allocation5]  }
  0x11   :  { %s37_s10 = sshll.u32 %s993_s6, 4  ;;  %s38_s10 = int_to_ptr.vmem [resolvable:$true] %s37_s10 }
  0x12   :  { %s974_s11 = scalar_lea.vmem %s38_s10, 8192  ;;  %p979_p6 = scmp.lt.s32.totalorder %s38_s10, %s38_s10 }
  0x13   :  { %p975_p5 = scmp.ne.s32.totalorder %s38_s10, %s974_s11  ;;  %p980_p7 = scmp.lt.s32.totalorder %s974_s11, %s974_s11 }
  0x15   :  { %p981_p8 = por %p980_p7, %p979_p6 }
  0x17   :  { %p982_p9 = pnand %p981_p8, %p975_p5 }
  0x19   :  { %985 = shalt.err (!%p982_p9)
}
  0x1a   :  { %s994_s12 = smov 128   ;;  %s995_s13 = smov 8  }
  0x1b   :  { %43 = dma.hbm_to_vmem [thread:$0]  %s1079_s3, 8192, %s38_s10, [#allocation6], %s994_s12, %s994_s12, %s995_s13  }
  0x1c   :  { %986 = dma.done.wait [#allocation4], 512  }
  0x1d   :  { %987 = vsyncadd [#allocation4], 4294966784 }
  0x1e   :  { %988 = dma.done.wait [#allocation6], 8192  }
  0x1f   :  { %989 = vsyncadd [#allocation6], 4294959104  ;;  %v996_v1 = vmov 0   ;;  %v844_v2 = vld [vmem:[#allocation3 + $0x4] ss:$16 sps:$4 sm:$0xff]   ;;  %vm104_vm0 = vcmask 130048  }
  0x20   :  { %140 = vmatprep.mubr.bf16.mxu0 %v996_v1  ;;  %181 = vmatprep.mubr.bf16.mxu1 %v996_v1  ;;  %v846_v3 = vld [vmem:[#allocation3 + $0xc] ss:$16 sps:$4 sm:$0xff]   ;;  %v848_v4 = vld [vmem:[#allocation3] ss:$16 sps:$4 sm:$0xff]   ;;  %v849_v5 = vld [vmem:[#allocation3 + $0x8] ss:$16 sps:$4 sm:$0xff]  }
  0x21   :  { %843 = vset.pattern.permute.xlu0 %v996_v1  ;;  %122 = vmatprep.subr.bf16.mxu0 %v844_v2  ;;  %v57_v6 = vld [vmem:[%s1076_s0] sm:$0xf]  ;;  %v850_v7 = vld [vmem:[#allocation5 + $0x70] ss:$8 sps:$4 sm:$0xff]   ;;  %v858_v11 = vld [vmem:[#allocation5 + $0x64] ss:$8 sps:$4 sm:$0xff]  }
  0x22   :  { %163 = vmatprep.subr.bf16.mxu1 %v846_v3  ;;  %123 = vmatpush1.bf16.msra.mxu0 %v848_v4  ;;  %v852_v8 = vld [vmem:[#allocation5 + $0x74] ss:$8 sps:$4 sm:$0xff]   ;;  %v853_v9 = vld [vmem:[#allocation5 + $0x170] ss:$8 sps:$4 sm:$0xff]   ;;  %v856_v12 = vld [vmem:[#allocation5 + $0x60] ss:$8 sps:$4 sm:$0xff]  }
  0x23   :  { %164 = vmatpush1.bf16.msra.mxu1 %v849_v5  ;;  %v855_v10 = vld [vmem:[#allocation5 + $0x174] ss:$8 sps:$4 sm:$0xff]   ;;  %594 = vmatprep.subr.bf16.mxu0 %v852_v8  ;;  %v861_v13 = vld [vmem:[#allocation5 + $0x164] ss:$8 sps:$4 sm:$0xff]   ;;  %v859_v14 = vld [vmem:[#allocation5 + $0x160] ss:$8 sps:$4 sm:$0xff]   ;;  %v64_v8 = vlaneseq }
  0x24   :  { %635 = vmatprep.subr.bf16.mxu1 %v855_v10  ;;  %v864_v15 = vld [vmem:[#allocation5 + $0x54] ss:$8 sps:$4 sm:$0xff]   ;;  %v862_v17 = vld [vmem:[#allocation5 + $0x50] ss:$8 sps:$4 sm:$0xff]   ;;  %v870_v19 = vld [vmem:[#allocation5 + $0x44] ss:$8 sps:$4 sm:$0xff]  }
  0x25   :  { %768 = vmatmul.mubr.msk.bf16.vlgmr.msra.gmra.mxu0 %vm104_vm0, %v57_v6  ;;  %v867_v16 = vld [vmem:[#allocation5 + $0x154] ss:$8 sps:$4 sm:$0xff]   ;;  %v865_v18 = vld [vmem:[#allocation5 + $0x150] ss:$8 sps:$4 sm:$0xff]   ;;  %v873_v20 = vld [vmem:[#allocation5 + $0x144] ss:$8 sps:$4 sm:$0xff]  }
  0x26   :  { %769 = vmatmul.mubr.msk.bf16.vlgmr.msra.gmra.mxu1 %vm104_vm0, %v57_v6  ;;  %595 = vmatpush1.bf16.msra.mxu0 %v850_v7  ;;  %v868_v21 = vld [vmem:[#allocation5 + $0x40] ss:$8 sps:$4 sm:$0xff]   ;;  %v876_v23 = vld [vmem:[#allocation5 + $0x34] ss:$8 sps:$4 sm:$0xff]   ;;  %v874_v25 = vld [vmem:[#allocation5 + $0x30] ss:$8 sps:$4 sm:$0xff]  }
  0x27   :  { %636 = vmatpush1.bf16.msra.mxu1 %v853_v9  ;;  %596 = vmatprep.subr.bf16.mxu0 %v858_v11  ;;  %v871_v22 = vld [vmem:[#allocation5 + $0x140] ss:$8 sps:$4 sm:$0xff]   ;;  %v879_v24 = vld [vmem:[#allocation5 + $0x134] ss:$8 sps:$4 sm:$0xff]   ;;  %v877_v26 = vld [vmem:[#allocation5 + $0x130] ss:$8 sps:$4 sm:$0xff]  }
  0x28   :  { %637 = vmatprep.subr.bf16.mxu1 %v861_v13  ;;  %v882_v27 = vld [vmem:[#allocation5 + $0x24] ss:$8 sps:$4 sm:$0xff]   ;;  %v880_v29 = vld [vmem:[#allocation5 + $0x20] ss:$8 sps:$4 sm:$0xff]   ;;  %v888_v31 = vld [vmem:[#allocation5 + $0x14] ss:$8 sps:$4 sm:$0xff]  }
  0x29   :  { %v885_v28 = vld [vmem:[#allocation5 + $0x124] ss:$8 sps:$4 sm:$0xff]   ;;  %v883_v30 = vld [vmem:[#allocation5 + $0x120] ss:$8 sps:$4 sm:$0xff]   ;;  %v891_v32 = vld [vmem:[#allocation5 + $0x114] ss:$8 sps:$4 sm:$0xff]  }
  0x2a   :  { %597 = vmatpush1.bf16.msra.mxu0 %v856_v12  ;;  %v886_v33 = vld [vmem:[#allocation5 + $0x10] ss:$8 sps:$4 sm:$0xff]   ;;  %v894_v35 = vld [vmem:[#allocation5 + $0x4] ss:$8 sps:$4 sm:$0xff]   ;;  %v892_v37 = vld [vmem:[#allocation5] ss:$8 sps:$4 sm:$0xff]  }
  0x2b   :  { %638 = vmatpush1.bf16.msra.mxu1 %v859_v14  ;;  %598 = vmatprep.subr.bf16.mxu0 %v864_v15  ;;  %v889_v34 = vld [vmem:[#allocation5 + $0x110] ss:$8 sps:$4 sm:$0xff]   ;;  %v897_v36 = vld [vmem:[#allocation5 + $0x104] ss:$8 sps:$4 sm:$0xff]   ;;  %v895_v38 = vld [vmem:[#allocation5 + $0x100] ss:$8 sps:$4 sm:$0xff]  }
  0x2c   :  { %639 = vmatprep.subr.bf16.mxu1 %v867_v16  ;;  %v900_v39 = vld [vmem:[#allocation5 + $0xf4] ss:$8 sps:$4 sm:$0xff]   ;;  %v898_v41 = vld [vmem:[#allocation5 + $0xf0] ss:$8 sps:$4 sm:$0xff]   ;;  %v906_v43 = vld [vmem:[#allocation5 + $0xe4] ss:$8 sps:$4 sm:$0xff]  }
  0x2d   :  { %v903_v40 = vld [vmem:[#allocation5 + $0x1f4] ss:$8 sps:$4 sm:$0xff]   ;;  %v901_v42 = vld [vmem:[#allocation5 + $0x1f0] ss:$8 sps:$4 sm:$0xff]   ;;  %v904_v44 = vld [vmem:[#allocation5 + $0xe0] ss:$8 sps:$4 sm:$0xff]  }
  0x2e   :  { %599 = vmatpush1.bf16.msra.mxu0 %v862_v17  ;;  %v909_v45 = vld [vmem:[#allocation5 + $0x1e4] ss:$8 sps:$4 sm:$0xff]   ;;  %v907_v46 = vld [vmem:[#allocation5 + $0x1e0] ss:$8 sps:$4 sm:$0xff]   ;;  %v912_v47 = vld [vmem:[#allocation5 + $0xd4] ss:$8 sps:$4 sm:$0xff]  }
  0x2f   :  { %640 = vmatpush1.bf16.msra.mxu1 %v865_v18  ;;  %600 = vmatprep.subr.bf16.mxu0 %v870_v19  ;;  %v915_v48 = vld [vmem:[#allocation5 + $0x1d4] ss:$8 sps:$4 sm:$0xff]   ;;  %v910_v49 = vld [vmem:[#allocation5 + $0xd0] ss:$8 sps:$4 sm:$0xff]   ;;  %v918_v51 = vld [vmem:[#allocation5 + $0xc4] ss:$8 sps:$4 sm:$0xff]  }
  0x30   :  { %641 = vmatprep.subr.bf16.mxu1 %v873_v20  ;;  %v913_v50 = vld [vmem:[#allocation5 + $0x1d0] ss:$8 sps:$4 sm:$0xff]   ;;  %v921_v52 = vld [vmem:[#allocation5 + $0x1c4] ss:$8 sps:$4 sm:$0xff]   ;;  %v916_v53 = vld [vmem:[#allocation5 + $0xc0] ss:$8 sps:$4 sm:$0xff]  }
  0x31   :  { %v919_v54 = vld [vmem:[#allocation5 + $0x1c0] ss:$8 sps:$4 sm:$0xff]   ;;  %v924_v55 = vld [vmem:[#allocation5 + $0xb4] ss:$8 sps:$4 sm:$0xff]   ;;  %v922_v57 = vld [vmem:[#allocation5 + $0xb0] ss:$8 sps:$4 sm:$0xff]  }
  0x32   :  { %601 = vmatpush1.bf16.msra.mxu0 %v868_v21  ;;  %v927_v56 = vld [vmem:[#allocation5 + $0x1b4] ss:$8 sps:$4 sm:$0xff]   ;;  %v925_v58 = vld [vmem:[#allocation5 + $0x1b0] ss:$8 sps:$4 sm:$0xff]   ;;  %v930_v59 = vld [vmem:[#allocation5 + $0xa4] ss:$8 sps:$4 sm:$0xff]  }
  0x33   :  { %642 = vmatpush1.bf16.msra.mxu1 %v871_v22  ;;  %602 = vmatprep.subr.bf16.mxu0 %v876_v23  ;;  %v933_v60 = vld [vmem:[#allocation5 + $0x1a4] ss:$8 sps:$4 sm:$0xff]   ;;  %v928_v61 = vld [vmem:[#allocation5 + $0xa0] ss:$8 sps:$4 sm:$0xff]   ;;  %v936_v63 = vld [vmem:[#allocation5 + $0x94] ss:$8 sps:$4 sm:$0xff]  }
  0x34   :  { %643 = vmatprep.subr.bf16.mxu1 %v879_v24  ;;  %v931_v62 = vld [vmem:[#allocation5 + $0x1a0] ss:$8 sps:$4 sm:$0xff]   ;;  %v939_v0 = vld [vmem:[#allocation5 + $0x194] ss:$8 sps:$4 sm:$0xff]   ;;  %v934_v2 = vld [vmem:[#allocation5 + $0x90] ss:$8 sps:$4 sm:$0xff]  }
  0x35   :  { %v937_v3 = vld [vmem:[#allocation5 + $0x190] ss:$8 sps:$4 sm:$0xff]   ;;  %v942_v4 = vld [vmem:[#allocation5 + $0x84] ss:$8 sps:$4 sm:$0xff]   ;;  %v940_v6 = vld [vmem:[#allocation5 + $0x80] ss:$8 sps:$4 sm:$0xff]  }
  0x36   :  { %603 = vmatpush1.bf16.msra.mxu0 %v874_v25  ;;  %v945_v5 = vld [vmem:[#allocation5 + $0x184] ss:$8 sps:$4 sm:$0xff]   ;;  %v943_v7 = vld [vmem:[#allocation5 + $0x180] ss:$8 sps:$4 sm:$0xff]   ;;  %v65_v9 = vshrl.u32 %v64_v8, 7  ;;  %vm756_vm1 = vcmask 57344  }
  0x37   :  { %644 = vmatpush1.bf16.msra.mxu1 %v877_v26  ;;  %604 = vmatprep.subr.bf16.mxu0 %v882_v27  ;;  %v62_v12 = vld [vmem:[%s1078_s2] sm:$0xf] }
  0x38   :  { %645 = vmatprep.subr.bf16.mxu1 %v885_v28  ;;  %v1053_v10 = vsub.s32 0, %v65_v9  ;;  %v74_v11 = vsub.s32 2, %v65_v9  ;;  %v70_v13 = vsub.s32 1, %v65_v9  ;;  %v78_v14 = vsub.s32 3, %v65_v9 }
  0x3a   :  { %605 = vmatpush1.bf16.msra.mxu0 %v880_v29  ;;  %v67_v15 = vrot.slane %v62_v12, %v1053_v10  ;;  %v75_v16 = vrot.slane %v62_v12, %v74_v11  ;;  %v71_v17 = vrot.slane %v62_v12, %v70_v13  ;;  %v79_v18 = vrot.slane %v62_v12, %v78_v14 }
  0x3b   :  { %646 = vmatpush1.bf16.msra.mxu1 %v883_v30  ;;  %606 = vmatprep.subr.bf16.mxu0 %v888_v31 }
  0x3c   :  { %647 = vmatprep.subr.bf16.mxu1 %v891_v32 }
  0x3e   :  { %607 = vmatpush1.bf16.msra.mxu0 %v886_v33 }
  0x3f   :  { %648 = vmatpush1.bf16.msra.mxu1 %v889_v34  ;;  %608 = vmatprep.subr.bf16.mxu0 %v894_v35 }
  0x40   :  { %649 = vmatprep.subr.bf16.mxu1 %v897_v36 }
  0x42   :  { %609 = vmatpush1.bf16.msra.mxu0 %v892_v37 }
  0x43   :  { %650 = vmatpush1.bf16.msra.mxu1 %v895_v38  ;;  %610 = vmatprep.subr.bf16.mxu0 %v900_v39  ;;  %v997_v39 = vmov 1966171168  }
  0x44   :  { %651 = vmatprep.subr.bf16.mxu1 %v903_v40  ;;  %v701_v40 = vunpack.c.l.s4 %v997_v39 }
  0x46   :  { %611 = vmatpush2.bf16.msra.mxu0 %v898_v41  ;;  %v834_v41 = vld.sshfl [vmem:[%s1081_s5] sm:$0x11 pattern:$0x75316420] }
  0x47   :  { %652 = vmatpush2.bf16.msra.mxu1 %v901_v42  ;;  %612 = vmatprep.subr.bf16.mxu0 %v906_v43  ;;  %v702_v42 = vunpack.c.0.s8 %v701_v40  ;;  %v699_v43 = vcombine.high %v834_v41, %v834_v41 }
  0x48   :  { %653 = vmatprep.subr.bf16.mxu1 %v909_v45 }
  0x4a   :  { %613 = vmatpush2.bf16.msra.mxu0 %v904_v44  ;;  %v705_v44 = vsub.s32 %v702_v42, %v65_v9 }
  0x4b   :  { %654 = vmatpush2.bf16.msra.mxu1 %v907_v46  ;;  %614 = vmatprep.subr.bf16.mxu0 %v912_v47  ;;  %v681_v47 = vld [vmem:[#allocation2] sm:$0x1] }
  0x4c   :  { %655 = vmatprep.subr.bf16.mxu1 %v915_v48  ;;  %v713_v45 = vrot.slane %v699_v43, %v705_v44  ;;  %v706_v46 = vrot.slane %v834_v41, %v705_v44  ;;  %684 = vperm.xlu0 %843, %v681_v47   ;;  %v262_v48 = vld [vmem:[%s1080_s4] sm:$0x3] }
  0x4e   :  { %615 = vmatpush2.bf16.msra.mxu0 %v910_v49  ;;  %v267_v49 = vrot.slane %v262_v48, %v1053_v10 }
  0x4f   :  { %656 = vmatpush2.bf16.msra.mxu1 %v913_v50  ;;  %616 = vmatprep.subr.bf16.mxu0 %v918_v51  ;;  %v271_v50 = vrot.slane %v262_v48, %v70_v13 }
  0x50   :  { %657 = vmatprep.subr.bf16.mxu1 %v921_v52 }
  0x52   :  { %617 = vmatpush2.bf16.msra.mxu0 %v916_v53 }
  0x53   :  { %658 = vmatpush2.bf16.msra.mxu1 %v919_v54  ;;  %618 = vmatprep.subr.bf16.mxu0 %v924_v55 }
  0x54   :  { %659 = vmatprep.subr.bf16.mxu1 %v927_v56 }
  0x56   :  { %619 = vmatpush2.bf16.msra.mxu0 %v922_v57 }
  0x57   :  { %660 = vmatpush2.bf16.msra.mxu1 %v925_v58  ;;  %620 = vmatprep.subr.bf16.mxu0 %v930_v59 }
  0x58   :  { %661 = vmatprep.subr.bf16.mxu1 %v933_v60 }
  0x5a   :  { %621 = vmatpush2.bf16.msra.mxu0 %v928_v61 }
  0x5b   :  { %662 = vmatpush2.bf16.msra.mxu1 %v931_v62  ;;  %622 = vmatprep.subr.bf16.mxu0 %v936_v63 }
  0x5c   :  { %663 = vmatprep.subr.bf16.mxu1 %v939_v0 }
  0x5e   :  { %623 = vmatpush2.bf16.msra.mxu0 %v934_v2 }
  0x5f   :  { %664 = vmatpush2.bf16.msra.mxu1 %v937_v3  ;;  %624 = vmatprep.subr.bf16.mxu0 %v942_v4 }
  0x60   :  { %665 = vmatprep.subr.bf16.mxu1 %v945_v5 }
  0x62   :  { %625 = vmatpush2.bf16.msra.mxu0 %v940_v6 }
  0x63   :  { %666 = vmatpush2.bf16.msra.mxu1 %v943_v7 }
  0xc7   :  { %v685_v4 = vpop.permute.xlu0 %684 }
  0xc8   :  { %v690_v5 = vrot.slane %v685_v4, %v1053_v10 }
  0xe5   :  { %v142_v19 = vpop.f32.mrf.mxu0 }
  0xe6   :  { %v183_v20 = vpop.f32.mrf.mxu1  ;;  %v143_v21 = vadd.f32 %v142_v19, %v67_v15 }
  0xe7   :  { %v184_v22 = vadd.f32 %v183_v20, %v75_v16  ;;  %v144_v23 = vpop.f32.mrf.mxu0 }
  0xe8   :  { %v185_v24 = vpop.f32.mrf.mxu1  ;;  %v145_v26 = vadd.f32 %v144_v23, %v71_v17  ;;  %v190_v28 = vpack.c.bf16 %v143_v21, %v143_v21 }
  0xe9   :  { %v192_v25 = vpack.c.bf16 %v184_v22, %v184_v22  ;;  %v186_v27 = vadd.f32 %v185_v24, %v79_v18  ;;  %v146_v29 = vpop.f32.mrf.mxu0 }
  0xea   :  { %v187_v30 = vpop.f32.mrf.mxu1  ;;  %v191_v31 = vpack.c.bf16 %v145_v26, %v145_v26  ;;  %v194_v38 = vmax.bf16 %v996_v1, %v190_v28 }
  0xeb   :  { %v193_v32 = vpack.c.bf16 %v186_v27, %v186_v27  ;;  %v196_v33 = vmax.bf16 %v996_v1, %v192_v25  ;;  %v147_v34 = vpop.f32.mrf.mxu0 }
  0xec   :  { %v188_v35 = vpop.f32.mrf.mxu1  ;;  %v195_v36 = vmax.bf16 %v996_v1, %v191_v31 }
  0xed   :  { %v197_v37 = vmax.bf16 %v996_v1, %v193_v32 }
  0xee   :  { %626 = vmatprep.mubr.bf16.mxu0 %v195_v36 }
  0xef   :  { %667 = vmatprep.mubr.bf16.mxu1 %v197_v37  ;;  %627 = vmatmul.mubr.bf16.vlgmr.msra.gmra.mxu0 %v194_v38 }
  0xf0   :  { %668 = vmatmul.mubr.bf16.vlgmr.msra.gmra.mxu1 %v196_v33  ;;  %748 = vmatprep.mubr.bf16.mxu0 %v713_v45 }
 0x1af   :  { %v628_v51 = vpop.f32.mrf.mxu0 }
 0x1b0   :  { %v669_v52 = vpop.f32.mrf.mxu1  ;;  %v629_v53 = vadd.f32 %v628_v51, %v267_v49 }
 0x1b1   :  { %v630_v54 = vpop.f32.mrf.mxu0 }
 0x1b2   :  { %v671_v55 = vpop.f32.mrf.mxu1  ;;  %v670_v56 = vadd.f32 %v669_v52, %v629_v53  ;;  %v631_v57 = vadd.f32 %v630_v54, %v271_v50 }
 0x1b3   :  { %v632_v58 = vpop.f32.mrf.mxu0 }
 0x1b4   :  { %v673_v59 = vpop.f32.mrf.mxu1  ;;  %v672_v60 = vadd.f32 %v671_v55, %v631_v57  ;;  %v676_v61 = vpack.c.bf16 %v670_v56, %v670_v56 }
 0x1b5   :  { %v633_v62 = vpop.f32.mrf.mxu0 }
 0x1b6   :  { %v674_v63 = vpop.f32.mrf.mxu1  ;;  %v677_v0 = vpack.c.bf16 %v672_v60, %v672_v60  ;;  %v678_v3 = vmax.bf16 %v996_v1, %v676_v61 }
 0x1b8   :  { %v679_v2 = vmax.bf16 %v996_v1, %v677_v0 }
 0x1ba   :  { %730 = vmatprep.subr.bf16.mxu0 %v679_v2 }
 0x1bb   :  { %731 = vmatpush1.bf16.xpose.msra.mxu0 %v678_v3 }
 0x1c2   :  { %749 = vmatmul.mubr.bf16.vlgmr.msra.gmra.mxu0 %v706_v46 }
 0x282   :  { %v750_v6 = vpop.f32.mrf.mxu0 }
 0x283   :  { %v751_v7 = vadd.f32 %v750_v6, %v690_v5 }
 0x284   :  { %v752_v8 = vpop.f32.mrf.mxu0 }
 0x285   :  { %757 = vst.msk [vmem:[%s1083_s7] sm:$0x1] %vm756_vm1, %v751_v7 }
 0x286   :  { %v753_v9 = vpop.f32.mrf.mxu0 }
 0x288   :  { %v754_v11 = vpop.f32.mrf.mxu0 }
 0x289   :  { %762 = vsyncpa [#allocation4], 1 }
 0x28a   :  { %763 = vsyncpa [#allocation6], 1 }

</bundles_post_ra>
